<compile_context>
chip_gen: v6e
topology: v6e:2x2x1
jax: 0.10.0
libtpu: 0.0.40
codegen_flags: <defaults>
</compile_context>

<pallas_src>
import functools

import jax
import jax.numpy as jnp
from jax.experimental import pallas as pl
from jax.experimental.pallas import tpu as pltpu


def _channel_attention_kernel(x_ref, w1t_ref, w2t_ref, o_ref,
                              sum_acc, max_acc,
                              *, l_tile, rem, inv_l, b_tile):
    # x_ref:   (b_tile, C, l_tile)   current tile of the input (native dtype)
    # w1t_ref: (C, H)                transpose of Conv1d-1 weight (resident)
    # w2t_ref: (H, C)                transpose of Conv1d-2 weight (resident)
    # o_ref:   (b_tile, C)           output block (written only at l == last)
    # sum_acc / max_acc: VMEM (b_tile, C) f32 running accumulators
    l_idx = pl.program_id(1)
    last = pl.num_programs(1) - 1

    @pl.when(l_idx == 0)
    def _init():
        sum_acc[...] = jnp.zeros_like(sum_acc)
        max_acc[...] = jnp.full_like(max_acc, -jnp.inf)

    def _accumulate(width):
        # Only valid lanes are read -> no iota/where masking anywhere.
        xv = x_ref[:, :, :width]
        sum_acc[...] += jnp.sum(xv, axis=-1, dtype=jnp.float32)
        max_acc[...] = jnp.maximum(max_acc[...],
                                   jnp.max(xv, axis=-1).astype(jnp.float32))

    if rem == l_tile:
        # Every tile (including the single-block fast path) is full: one
        # unconditional, unmasked accumulate.
        _accumulate(l_tile)
    else:
        # Only the last L step is partial; full tiles keep the fast path.
        @pl.when(l_idx != last)
        def _full_tile():
            _accumulate(l_tile)

        @pl.when(l_idx == last)
        def _partial_tile():
            _accumulate(rem)

    @pl.when(l_idx == last)
    def _finalize():
        avg = sum_acc[...] * inv_l                   # mean = sum * (1/L)
        mx = max_acc[...]
        # Single matmul pair shared by both pooled operands.
        p = jnp.concatenate([avg, mx], axis=0)       # (2*b_tile, C)
        w1t = w1t_ref[...].astype(jnp.float32)       # (C, H)
        w2t = w2t_ref[...].astype(jnp.float32)       # (H, C)
        h = jnp.dot(p, w1t, preferred_element_type=jnp.float32)
        h = jnp.maximum(h, 0.0)                      # ReLU
        y = jnp.dot(h, w2t, preferred_element_type=jnp.float32)
        out = y[:b_tile] + y[b_tile:]                # fc(avg) + fc(max)
        o_ref[...] = jax.nn.sigmoid(out).astype(o_ref.dtype)


def channel_attention(x, w1, w2, *, vmem_budget_bytes=None):
    """x: (B, C, L); w1: (H, C) first 1x1-conv weight; w2: (C, H) second.

    Returns (B, C, 1), matching ChannelAttention.forward.
    `vmem_budget_bytes` optionally caps the per-buffer input budget (mainly
    for testing the multi-step L pipeline); it is always clamped to the
    hardware-derived limit.
    """
    B, C, L = x.shape
    H = w1.shape[0]
    assert w1.shape == (H, C) and w2.shape == (C, H)

    # Glue: pre-transpose the 1x1-conv weights so the kernel does plain
    # (rows, C) @ (C, H) and (rows, H) @ (H, C) matmuls.
    w1t = jnp.transpose(w1)  # (C, H)
    w2t = jnp.transpose(w2)  # (H, C)

    itemsize = jnp.dtype(x.dtype).itemsize

    # ---- VMEM budget, derived from the actual part ------------------------
    # v5e/v6e: 128 MiB VMEM; v7x: 64 MiB.  Keep ~25% headroom for compiler
    # internal scratch, plus an explicit reserve for weights/output/acc.
    try:
        info = pltpu.get_tpu_info()
        vmem_cap = int(getattr(info, "vmem_capacity_bytes", 0)) or (64 << 20)
    except Exception:
        vmem_cap = 64 << 20                       # conservative fallback
    vmem_limit = (3 * vmem_cap) // 4              # ~48 MiB v7x, ~96 MiB v5e/v6e
    reserve = 4 << 20                             # weights + out + scratch + slack
    per_buf = max(1 << 20, (vmem_limit - reserve) // 2)   # input is double-buffered
    if vmem_budget_bytes is not None:
        per_buf = min(per_buf, int(vmem_budget_bytes))    # never above HW limit

    # ---- B tiling ----------------------------------------------------------
    if B < 16:
        # Full-B block keeps the 2-D output BlockSpec layout-legal.  (Megacore
        # split for B < 16 would need a parallel C axis + hoisted epilogue.)
        b_tile = B
    else:
        # Multiple of 8, targeting >= 2 parallel blocks for megacore; shrink
        # (in steps of 8) if that lets a full-L block fit the budget.
        b_tile = max(8, min(64, (B // 2) // 8 * 8))
        while b_tile > 8 and b_tile * C * L * itemsize > per_buf:
            b_tile -= 8

    # ---- L tiling: full L in one block whenever the budget allows ----------
    if b_tile * C * L * itemsize <= per_buf:
        l_tile = L                     # single reduction step, no carry, no mask
    else:
        row_bytes = b_tile * C * itemsize
        l_tile = max(128, (per_buf // row_bytes) // 128 * 128)
        if l_tile >= L:
            l_tile = L

    nb = pl.cdiv(B, b_tile)
    nl = pl.cdiv(L, l_tile)
    rem = L - (nl - 1) * l_tile        # valid lanes in the last L tile (> 0)

    kernel = functools.partial(
        _channel_attention_kernel,
        l_tile=l_tile, rem=rem, inv_l=1.0 / float(L), b_tile=b_tile)

    cost = pl.CostEstimate(
        flops=2 * B * C * L + 2 * (2 * B) * C * H * 2,   # pool + two matmuls
        transcendentals=B * C,                           # sigmoid
        bytes_accessed=(B * C * L * itemsize
                        + B * C * itemsize
                        + 2 * C * H * jnp.dtype(w1.dtype).itemsize),
    )

    out = pl.pallas_call(
        kernel,
        out_shape=jax.ShapeDtypeStruct((B, C), x.dtype),
        grid_spec=pltpu.PrefetchScalarGridSpec(
            num_scalar_prefetch=0,
            grid=(nb, nl),
            in_specs=[
                pl.BlockSpec((b_tile, C, l_tile), lambda b, l: (b, 0, l)),
                # Constant index maps -> weights DMA'd once, stay resident.
                pl.BlockSpec((C, H), lambda b, l: (0, 0)),
                pl.BlockSpec((H, C), lambda b, l: (0, 0)),
            ],
            out_specs=pl.BlockSpec((b_tile, C), lambda b, l: (b, 0)),
            scratch_shapes=[
                pltpu.VMEM((b_tile, C), jnp.float32),   # running sum
                pltpu.VMEM((b_tile, C), jnp.float32),   # running max
            ],
        ),
        compiler_params=pltpu.CompilerParams(
            dimension_semantics=("parallel", "arbitrary"),
            vmem_limit_bytes=int(vmem_limit),
        ),
        cost_estimate=cost,
    )(x, w1t, w2t)
    return out.reshape(B, C, 1)


if __name__ == "__main__":
    key = jax.random.PRNGKey(0)
    # C/ratio must be a positive integer (as in the PyTorch module).  L is
    # deliberately not a multiple of 128.
    B, C, ratio, L = 4, 64, 16, 300
    H = C // ratio  # 4

    kx, k1, k2 = jax.random.split(key, 3)
    x = jax.random.normal(kx, (B, C, L), dtype=jnp.float32)
    # Conv1d kernels of size 1, squeezed:
    #   fc[0].weight: (H, C, 1) -> (H, C);  fc[2].weight: (C, H, 1) -> (C, H)
    w1 = jax.random.normal(k1, (H, C), dtype=jnp.float32) * (1.0 / jnp.sqrt(C))
    w2 = jax.random.normal(k2, (C, H), dtype=jnp.float32) * (1.0 / jnp.sqrt(H))

    # Pure-JAX reference.
    def fc_ref(p):
        return jnp.maximum(p @ w1.T, 0.0) @ w2.T

    def ref_fn(xx):
        return jax.nn.sigmoid(fc_ref(jnp.mean(xx, axis=-1))
                              + fc_ref(jnp.max(xx, axis=-1))).reshape(B, C, 1)

    ref = ref_fn(x)

    # 1) Default path: budget-driven single-L-block fast path (nl == 1).
    out = jax.block_until_ready(channel_attention(x, w1, w2))
    assert out.shape == (B, C, 1)
    assert jnp.allclose(out, ref, atol=1e-5, rtol=1e-5), float(
        jnp.max(jnp.abs(out - ref)))

    # 2) Force the multi-step L pipeline with a partial last tile
    #    (l_tile = 128, nl = 3, rem = 44) via a tiny test budget.
    out2 = jax.block_until_ready(
        channel_attention(x, w1, w2, vmem_budget_bytes=64 * 1024))
    assert jnp.allclose(out2, ref, atol=1e-5, rtol=1e-5), float(
        jnp.max(jnp.abs(out2 - ref)))

    # 3) All-negative input on the multi-step path (max accumulator path).
    xn = -jnp.abs(x) - 1.0
    outn = jax.block_until_ready(
        channel_attention(xn, w1, w2, vmem_budget_bytes=64 * 1024))
    refn = ref_fn(xn)
    assert jnp.allclose(outn, refn, atol=1e-5, rtol=1e-5), float(
        jnp.max(jnp.abs(outn - refn)))

    print("KERNEL_OK")
</pallas_src>

<mosaic_0001>
module attributes {stable_mosaic.version = 11 : i64} {
  func.func @_channel_attention_kernel(%arg0: i32, %arg1: i32, %arg2: memref<4x64x300xf32, #tpu.memory_space<vmem>>, %arg3: memref<64x4xf32, #tpu.memory_space<vmem>>, %arg4: memref<4x64xf32, #tpu.memory_space<vmem>>, %arg5: memref<4x64xf32, #tpu.memory_space<vmem>>, %arg6: memref<4x64xf32, #tpu.memory_space<vmem>>, %arg7: memref<4x64xf32, #tpu.memory_space<vmem>>) attributes {dimension_semantics = [#tpu.dimension_semantics<parallel>, #tpu.dimension_semantics<arbitrary>], iteration_bounds = array<i64: 1, 1>, scalar_prefetch = 0 : i64, scratch_operands = 2 : i64, tpu.core_type = #tpu.core_type<tc>, window_params = [{transform_indices = @transform_0, window_bounds = array<i64: 4, 64, 300>}, {pipeline_mode = #tpu.pipeline_mode<synchronous>, transform_indices = @transform_1, window_bounds = array<i64: 64, 4>}, {pipeline_mode = #tpu.pipeline_mode<synchronous>, transform_indices = @transform_2, window_bounds = array<i64: 4, 64>}, {transform_indices = @transform_3, window_bounds = array<i64: 4, 64>}]} {
    %c0_i32 = arith.constant 0 : i32
    %0 = arith.cmpi eq, %arg1, %c0_i32 : i32
    %1 = arith.extui %0 : i1 to i32
    %c0_i32_0 = arith.constant 0 : i32
    %2 = arith.cmpi ne, %1, %c0_i32_0 : i32
    scf.if %2 {
      %cst_14 = arith.constant 0.000000e+00 : f32
      %15 = vector.broadcast %cst_14 : f32 to vector<4x64xf32>
      %c0_15 = arith.constant 0 : index
      %c0_16 = arith.constant 0 : index
      %16 = vector.load %arg6[%c0_15, %c0_16] : memref<4x64xf32, #tpu.memory_space<vmem>>, vector<4x64xf32>
      tpu.vector_store %arg6[%c0_15, %c0_16], %15 {strides = array<i32>} : memref<4x64xf32, #tpu.memory_space<vmem>>, vector<4x64xf32>,
      %cst_17 = arith.constant 0xFF800000 : f32
      %17 = vector.broadcast %cst_17 : f32 to vector<4x64xf32>
      %c0_18 = arith.constant 0 : index
      %c0_19 = arith.constant 0 : index
      %18 = vector.load %arg7[%c0_18, %c0_19] : memref<4x64xf32, #tpu.memory_space<vmem>>, vector<4x64xf32>
      tpu.vector_store %arg7[%c0_18, %c0_19], %17 {strides = array<i32>} : memref<4x64xf32, #tpu.memory_space<vmem>>, vector<4x64xf32>,
    } else {
    }
    %c0 = arith.constant 0 : index
    %c0_1 = arith.constant 0 : index
    %c0_2 = arith.constant 0 : index
    %3 = vector.load %arg2[%c0, %c0_1, %c0_2] : memref<4x64x300xf32, #tpu.memory_space<vmem>>, vector<4x64x300xf32>
    %c0_3 = arith.constant 0 : index
    %c0_4 = arith.constant 0 : index
    %4 = vector.load %arg6[%c0_3, %c0_4] : memref<4x64xf32, #tpu.memory_space<vmem>>, vector<4x64xf32>
    %cst = arith.constant dense<0.000000e+00> : vector<4x64xf32>
    %5 = vector.multi_reduction <add>, %3, %cst [2] : vector<4x64x300xf32> to vector<4x64xf32>
    %6 = arith.addf %4, %5 : vector<4x64xf32>
    %c0_5 = arith.constant 0 : index
    %c0_6 = arith.constant 0 : index
    %7 = vector.load %arg6[%c0_5, %c0_6] : memref<4x64xf32, #tpu.memory_space<vmem>>, vector<4x64xf32>
    tpu.vector_store %arg6[%c0_5, %c0_6], %6 {strides = array<i32>} : memref<4x64xf32, #tpu.memory_space<vmem>>, vector<4x64xf32>,
    %c0_7 = arith.constant 0 : index
    %c0_8 = arith.constant 0 : index
    %8 = vector.load %arg7[%c0_7, %c0_8] : memref<4x64xf32, #tpu.memory_space<vmem>>, vector<4x64xf32>
    %cst_9 = arith.constant dense<0xFF800000> : vector<4x64xf32>
    %9 = vector.multi_reduction <maximumf>, %3, %cst_9 [2] : vector<4x64x300xf32> to vector<4x64xf32>
    %10 = arith.maximumf %8, %9 : vector<4x64xf32>
    %c0_10 = arith.constant 0 : index
    %c0_11 = arith.constant 0 : index
    %11 = vector.load %arg7[%c0_10, %c0_11] : memref<4x64xf32, #tpu.memory_space<vmem>>, vector<4x64xf32>
    tpu.vector_store %arg7[%c0_10, %c0_11], %10 {strides = array<i32>} : memref<4x64xf32, #tpu.memory_space<vmem>>, vector<4x64xf32>,
    %c0_i32_12 = arith.constant 0 : i32
    %12 = arith.cmpi eq, %arg1, %c0_i32_12 : i32
    %13 = arith.extui %12 : i1 to i32
    %c0_i32_13 = arith.constant 0 : i32
    %14 = arith.cmpi ne, %13, %c0_i32_13 : i32
    scf.if %14 {
      %c0_14 = arith.constant 0 : index
      %c0_15 = arith.constant 0 : index
      %15 = vector.load %arg6[%c0_14, %c0_15] : memref<4x64xf32, #tpu.memory_space<vmem>>, vector<4x64xf32>
      %cst_16 = arith.constant 0.00333333341 : f32
      %16 = vector.broadcast %cst_16 : f32 to vector<4x64xf32>
      %17 = arith.mulf %15, %16 : vector<4x64xf32>
      %c0_17 = arith.constant 0 : index
      %c0_18 = arith.constant 0 : index
      %18 = vector.load %arg7[%c0_17, %c0_18] : memref<4x64xf32, #tpu.memory_space<vmem>>, vector<4x64xf32>
      %19 = tpu.concatenate %17, %18 in 0 : vector<4x64xf32>, vector<4x64xf32> -> vector<8x64xf32>
      %c0_19 = arith.constant 0 : index
      %c0_20 = arith.constant 0 : index
      %20 = vector.load %arg3[%c0_19, %c0_20] : memref<64x4xf32, #tpu.memory_space<vmem>>, vector<64x4xf32>
      %c0_21 = arith.constant 0 : index
      %c0_22 = arith.constant 0 : index
      %21 = vector.load %arg4[%c0_21, %c0_22] : memref<4x64xf32, #tpu.memory_space<vmem>>, vector<4x64xf32>
      %cst_23 = arith.constant dense<0.000000e+00> : vector<8x4xf32>
      %22 = tpu.matmul %19, %20, %cst_23 {dimension_numbers = #tpu.dot_dimension_numbers<[1], [0], [0], [1], [0, 0, 1, 1], [], []>} : vector<8x64xf32>, vector<64x4xf32>, vector<8x4xf32> -> vector<8x4xf32>
      %cst_24 = arith.constant 0.000000e+00 : f32
      %23 = vector.broadcast %cst_24 : f32 to vector<8x4xf32>
      %24 = arith.maximumf %22, %23 : vector<8x4xf32>
      %cst_25 = arith.constant dense<0.000000e+00> : vector<8x64xf32>
      %25 = tpu.matmul %24, %21, %cst_25 {dimension_numbers = #tpu.dot_dimension_numbers<[1], [0], [0], [1], [0, 0, 1, 1], [], []>} : vector<8x4xf32>, vector<4x64xf32>, vector<8x64xf32> -> vector<8x64xf32>
      %26 = vector.extract_strided_slice %25 {offsets = [0, 0], sizes = [4, 64], strides = [1, 1]} : vector<8x64xf32> to vector<4x64xf32>
      %27 = vector.extract_strided_slice %25 {offsets = [4, 0], sizes = [4, 64], strides = [1, 1]} : vector<8x64xf32> to vector<4x64xf32>
      %28 = arith.addf %26, %27 : vector<4x64xf32>
      %29 = arith.negf %28 : vector<4x64xf32>
      %30 = math.exp %29 : vector<4x64xf32>
      %cst_26 = arith.constant 1.000000e+00 : f32
      %31 = vector.broadcast %cst_26 : f32 to vector<4x64xf32>
      %32 = arith.addf %31, %30 : vector<4x64xf32>
      %33 = arith.divf %31, %32 : vector<4x64xf32>
      %c0_27 = arith.constant 0 : index
      %c0_28 = arith.constant 0 : index
      %34 = vector.load %arg5[%c0_27, %c0_28] : memref<4x64xf32, #tpu.memory_space<vmem>>, vector<4x64xf32>
      tpu.vector_store %arg5[%c0_27, %c0_28], %33 {strides = array<i32>} : memref<4x64xf32, #tpu.memory_space<vmem>>, vector<4x64xf32>,
    } else {
    }
    return
  }
  func.func @transform_0(%arg0: i32, %arg1: i32) -> (i32, i32, i32) {
    %c0_i32 = arith.constant 0 : i32
    %c0_i32_0 = arith.constant 0 : i32
    return %arg0, %c0_i32, %arg1 : i32, i32, i32
  }
  func.func @transform_1(%arg0: i32, %arg1: i32) -> (i32, i32) {
    %c0_i32 = arith.constant 0 : i32
    %c0_i32_0 = arith.constant 0 : i32
    %c0_i32_1 = arith.constant 0 : i32
    return %c0_i32, %c0_i32_0 : i32, i32
  }
  func.func @transform_2(%arg0: i32, %arg1: i32) -> (i32, i32) {
    %c0_i32 = arith.constant 0 : i32
    %c0_i32_0 = arith.constant 0 : i32
    %c0_i32_1 = arith.constant 0 : i32
    return %c0_i32, %c0_i32_0 : i32, i32
  }
  func.func @transform_3(%arg0: i32, %arg1: i32) -> (i32, i32) {
    %c0_i32 = arith.constant 0 : i32
    %c0_i32_0 = arith.constant 0 : i32
    return %arg0, %c0_i32 : i32, i32
  }
}

</mosaic_0001>

<bundles_post_ra>
// kernel: tpu_custom_call.1
= control target key start
LH: loop header
LB: loop body
LE: loop exit
PB: predicated region body
PF: predicated region fallthrough
CT: control target
= control target key end

     0   :  { %8 = vsyncpa [#allocation5], 0  ;;  %s1500_s0 = inlined_call_operand.hbm [shape: f32[4,64,300], index: 0, kind: input, shape index: {}]   ;;  %s1501_s1 = inlined_call_operand.vmem [shape: f32[64,4], index: 1, kind: input, shape index: {}]   ;;  %s1502_s2 = inlined_call_operand.vmem [shape: f32[4,64], index: 2, kind: input, shape index: {}]   ;;  %s1503_s3 = inlined_call_operand.hbm [shape: f32[4,64], index: 3, kind: output, shape index: {}]  }
   0x1   :  { %9 = vsyncpa [#allocation6], 0  ;;  %s1155_s12 = smov [#allocation4]  }
   0x2   :  { %s15_s13 = sshll.u32 %s1155_s12, 4  ;;  %s16_s13 = int_to_ptr.vmem [resolvable:$true] %s15_s13 }
   0x3   :  { %s1119_s14 = scalar_lea.vmem %s16_s13, 12288  ;;  %p1124_p1 = scmp.lt.s32.totalorder %s16_s13, %s16_s13 }
   0x4   :  { %p1120_p0 = scmp.ne.s32.totalorder %s16_s13, %s1119_s14  ;;  %p1125_p2 = scmp.lt.s32.totalorder %s1119_s14, %s1119_s14 }
   0x6   :  { %p1126_p3 = por %p1125_p2, %p1124_p1 }
   0x8   :  { %p1127_p4 = pnand %p1126_p3, %p1120_p0 }
   0xa   :  { %1130 = shalt.err (!%p1127_p4)
}
   0xb   :  { %s1156_s15 = smov 384   ;;  %s1157_s16 = smov 24  }
   0xc   :  { %21 = dma.hbm_to_vmem [thread:$0]  %s1500_s0, 12288, %s16_s13, [#allocation5], %s1156_s15, %s1156_s15, %s1157_s16  }
   0xd   :  { %1151 = dma.done.wait [#allocation5], 12288  }
   0xe   :  { %1152 = vsyncadd [#allocation5], 4294955008  ;;  %vm134_vm0 = vcmask 359424   ;;  %v60_v0 = vld [vmem:[#allocation4 + $0xc0] sm:$0xff]  ;;  %v61_v1 = vld [vmem:[#allocation4 + $0xc8] sm:$0xff]  ;;  %vm33_vm1 = vcmask 519168  }
   0xf   :  { %v62_v2 = vld [vmem:[#allocation4 + $0xd0] sm:$0xff]  ;;  %v174_v3 = vadd.f32 %v61_v1, %v60_v0  ;;  %v36_v5 = vld [vmem:[#allocation4] sm:$0xff]  ;;  %v37_v6 = vld [vmem:[#allocation4 + $0x8] sm:$0xff]  ;;  %v549_v32 = vmax.f32 %v60_v0, %v61_v1  ;;  %vm337_vm2 = vcmask 130112   ;;  %vm1160_vm3 = vmmov 0   ;;  %s1161_s8 = smov [#allocation7]  }
  0x10   :  { %v175_v4 = vsel %vm134_vm0, %v62_v2, 0.0  ;;  %v38_v7 = vld [vmem:[#allocation4 + $0x10] sm:$0xff]  ;;  %v133_v8 = vadd.f32 %v37_v6, %v36_v5  ;;  %v63_v10 = vld [vmem:[#allocation4 + $0xd8] sm:$0xff]  ;;  %v64_v11 = vld [vmem:[#allocation4 + $0xe0] sm:$0xff]  ;;  %v509_v26 = vmax.f32 %v36_v5, %v37_v6  ;;  %v550_v35 = vsel %vm134_vm0, %v62_v2, -inf  ;;  %s1052_s9 = sshll.u32 %s1161_s8, 4  ;;  %s1053_s9 = int_to_ptr.vmem [resolvable:$true] %s1052_s9 }
  0x11   :  { %v135_v9 = vsel %vm134_vm0, %v38_v7, 0.0  ;;  %v65_v12 = vld [vmem:[#allocation4 + $0xe8] sm:$0xff]  ;;  %v176_v13 = vadd.f32 %v175_v4, %v174_v3  ;;  %v179_v14 = vadd.f32 %v64_v11, %v63_v10  ;;  %v39_v16 = vld [vmem:[#allocation4 + $0x18] sm:$0xff]  ;;  %v40_v17 = vld [vmem:[#allocation4 + $0x20] sm:$0xff]  ;;  %v510_v27 = vsel %vm134_vm0, %v38_v7, -inf  ;;  %p1136_p6 = scmp.lt.s32.totalorder %s1053_s9, %s1053_s9 }
  0x12   :  { %v180_v15 = vsel %vm134_vm0, %v65_v12, 0.0  ;;  %v41_v18 = vld [vmem:[#allocation4 + $0x28] sm:$0xff]  ;;  %v136_v19 = vadd.f32 %v135_v9, %v133_v8  ;;  %v139_v20 = vadd.f32 %v40_v17, %v39_v16  ;;  %v514_v23 = vmax.f32 %v39_v16, %v40_v17  ;;  %v66_v33 = vld [vmem:[#allocation4 + $0xf0] sm:$0xff]  ;;  %v67_v34 = vld [vmem:[#allocation4 + $0xf8] sm:$0xff] }
  0x13   :  { %v140_v21 = vsel %vm134_vm0, %v41_v18, 0.0  ;;  %177 = vadd.xlane.f32.xlu1 %v176_v13  ;;  %v181_v22 = vadd.f32 %v180_v15, %v179_v14  ;;  %v515_v25 = vsel %vm134_vm0, %v41_v18, -inf  ;;  %v554_v29 = vmax.f32 %v63_v10, %v64_v11  ;;  %v68_v36 = vld [vmem:[#allocation4 + $0x100] sm:$0xff]  ;;  %v42_v37 = vld [vmem:[#allocation4 + $0x30] sm:$0xff]  ;;  %v43_v38 = vld [vmem:[#allocation4 + $0x38] sm:$0xff] }
  0x14   :  { %137 = vadd.xlane.f32.xlu0 %v136_v19  ;;  %v141_v24 = vadd.f32 %v140_v21, %v139_v20  ;;  %v516_v28 = vmax.f32 %v514_v23, %v515_v25  ;;  %v511_v30 = vmax.f32 %v509_v26, %v510_v27  ;;  %v555_v31 = vsel %vm134_vm0, %v65_v12, -inf  ;;  %v44_v39 = vld [vmem:[#allocation4 + $0x40] sm:$0xff]  ;;  %v87_v45 = vld [vmem:[#allocation4 + $0x198] sm:$0xff]  ;;  %v89_v48 = vld [vmem:[#allocation4 + $0x1a8] sm:$0xff] }
  0x15   :  { %v556_v40 = vmax.f32 %v554_v29, %v555_v31  ;;  %v184_v41 = vadd.f32 %v67_v34, %v66_v33  ;;  %v551_v42 = vmax.f32 %v549_v32, %v550_v35  ;;  %v185_v43 = vsel %vm134_vm0, %v68_v36, 0.0  ;;  %v88_v46 = vld [vmem:[#allocation4 + $0x1a0] sm:$0xff]  ;;  %v85_v50 = vld [vmem:[#allocation4 + $0x188] sm:$0xff]  ;;  %v86_v51 = vld [vmem:[#allocation4 + $0x190] sm:$0xff] }
  0x16   :  { %v144_v44 = vadd.f32 %v43_v38, %v42_v37  ;;  %v145_v47 = vsel %vm134_vm0, %v44_v39, 0.0  ;;  %v84_v49 = vld [vmem:[#allocation4 + $0x180] sm:$0xff]  ;;  %v219_v53 = vadd.f32 %v88_v46, %v87_v45  ;;  %v220_v55 = vsel %vm134_vm0, %v89_v48, 0.0  ;;  %v69_v5 = vld [vmem:[#allocation4 + $0x108] sm:$0xff]  ;;  %v70_v6 = vld [vmem:[#allocation4 + $0x110] sm:$0xff] }
  0x17   :  { %182 = vadd.xlane.f32.xlu1 %v181_v22  ;;  %v186_v52 = vadd.f32 %v185_v43, %v184_v41  ;;  %v214_v56 = vadd.f32 %v85_v50, %v84_v49  ;;  %v215_v57 = vsel %vm134_vm0, %v86_v51, 0.0  ;;  %v559_v59 = vmax.f32 %v66_v33, %v67_v34  ;;  %v71_v8 = vld [vmem:[#allocation4 + $0x118] sm:$0xff]  ;;  %v45_v9 = vld [vmem:[#allocation4 + $0x48] sm:$0xff]  ;;  %v46_v10 = vld [vmem:[#allocation4 + $0x50] sm:$0xff] }
  0x18   :  { %142 = vadd.xlane.f32.xlu0 %v141_v24  ;;  %v146_v54 = vadd.f32 %v145_v47, %v144_v44  ;;  %v221_v58 = vadd.f32 %v220_v55, %v219_v53  ;;  %v560_v61 = vsel %vm134_vm0, %v68_v36, -inf  ;;  %v519_v62 = vmax.f32 %v42_v37, %v43_v38  ;;  %v47_v11 = vld [vmem:[#allocation4 + $0x58] sm:$0xff]  ;;  %v108_v17 = vld [vmem:[#allocation4 + $0x240] sm:$0xff]  ;;  %v109_v18 = vld [vmem:[#allocation4 + $0x248] sm:$0xff] }
  0x19   :  { %v216_v60 = vadd.f32 %v215_v57, %v214_v56  ;;  %v520_v63 = vsel %vm134_vm0, %v44_v39, -inf  ;;  %v561_v0 = vmax.f32 %v559_v59, %v560_v61  ;;  %v594_v1 = vmax.f32 %v87_v45, %v88_v46  ;;  %v110_v20 = vld [vmem:[#allocation4 + $0x250] sm:$0xff]  ;;  %v91_v22 = vld [vmem:[#allocation4 + $0x1b8] sm:$0xff]  ;;  %v92_v23 = vld [vmem:[#allocation4 + $0x1c0] sm:$0xff] }
  0x1a   :  { %v521_v2 = vmax.f32 %v519_v62, %v520_v63  ;;  %v595_v3 = vsel %vm134_vm0, %v89_v48, -inf  ;;  %v589_v4 = vmax.f32 %v84_v49, %v85_v50  ;;  %v590_v7 = vsel %vm134_vm0, %v86_v51, -inf  ;;  %v90_v21 = vld [vmem:[#allocation4 + $0x1b0] sm:$0xff]  ;;  %v112_v31 = vld [vmem:[#allocation4 + $0x260] sm:$0xff]  ;;  %v113_v32 = vld [vmem:[#allocation4 + $0x268] sm:$0xff] }
  0x1b   :  { %517 = vmax.xlane.f32.xlu1 %v516_v28  ;;  %v596_v12 = vmax.f32 %v594_v1, %v595_v3  ;;  %v189_v13 = vadd.f32 %v70_v6, %v69_v5  ;;  %v190_v15 = vsel %vm134_vm0, %v71_v8, 0.0  ;;  %v149_v16 = vadd.f32 %v46_v10, %v45_v9  ;;  %v72_v50 = vld [vmem:[#allocation4 + $0x120] sm:$0xff]  ;;  %v73_v51 = vld [vmem:[#allocation4 + $0x128] sm:$0xff]  ;;  %v74_v53 = vld [vmem:[#allocation4 + $0x130] sm:$0xff] }
  0x1c   :  { %512 = vmax.xlane.f32.xlu0 %v511_v30  ;;  %v591_v14 = vmax.f32 %v589_v4, %v590_v7  ;;  %v150_v19 = vsel %vm134_vm0, %v47_v11, 0.0  ;;  %v254_v25 = vadd.f32 %v109_v18, %v108_v17  ;;  %v255_v27 = vsel %vm134_vm0, %v110_v20, 0.0  ;;  %v111_v30 = vld [vmem:[#allocation4 + $0x258] sm:$0xff]  ;;  %v49_v55 = vld [vmem:[#allocation4 + $0x68] sm:$0xff]  ;;  %v50_v56 = vld [vmem:[#allocation4 + $0x70] sm:$0xff] }
  0x1d   :  { %v191_v24 = vadd.f32 %v190_v15, %v189_v13  ;;  %v151_v26 = vadd.f32 %v150_v19, %v149_v16  ;;  %v224_v28 = vadd.f32 %v91_v22, %v90_v21  ;;  %v225_v29 = vsel %vm134_vm0, %v92_v23, 0.0  ;;  %v114_v62 = vld [vmem:[#allocation4 + $0x270] sm:$0xff]  ;;  %v115_v63 = vld [vmem:[#allocation4 + $0x278] sm:$0xff]  ;;  %v116_v1 = vld [vmem:[#allocation4 + $0x280] sm:$0xff] }
  0x1e   :  { %v256_v33 = vadd.f32 %v255_v27, %v254_v25  ;;  %v524_v34 = vmax.f32 %v45_v9, %v46_v10  ;;  %v525_v36 = vsel %vm134_vm0, %v47_v11, -inf  ;;  %v259_v37 = vadd.f32 %v112_v31, %v111_v30  ;;  %v94_v3 = vld [vmem:[#allocation4 + $0x1d0] sm:$0xff]  ;;  %v95_v4 = vld [vmem:[#allocation4 + $0x1d8] sm:$0xff]  ;;  %v77_v25 = vld [vmem:[#allocation4 + $0x148] sm:$0xff] }
  0x1f   :  { %557 = vmax.xlane.f32.xlu1 %v556_v40  ;;  %v226_v35 = vadd.f32 %v225_v29, %v224_v28  ;;  %v260_v38 = vsel %vm134_vm0, %v113_v32, 0.0  ;;  %v599_v40 = vmax.f32 %v90_v21, %v91_v22  ;;  %v564_v43 = vmax.f32 %v69_v5, %v70_v6  ;;  %v75_v22 = vld [vmem:[#allocation4 + $0x138] sm:$0xff]  ;;  %v52_v27 = vld [vmem:[#allocation4 + $0x80] sm:$0xff]  ;;  %v53_v28 = vld [vmem:[#allocation4 + $0x88] sm:$0xff] }
  0x20   :  { %552 = vmax.xlane.f32.xlu0 %v551_v42  ;;  %v526_v39 = vmax.f32 %v524_v34, %v525_v36  ;;  %v261_v41 = vadd.f32 %v260_v38, %v259_v37  ;;  %v600_v42 = vsel %vm134_vm0, %v92_v23, -inf  ;;  %v565_v44 = vsel %vm134_vm0, %v71_v8, -inf  ;;  %v76_v23 = vld [vmem:[#allocation4 + $0x140] sm:$0xff]  ;;  %v117_v34 = vld [vmem:[#allocation4 + $0x288] sm:$0xff]  ;;  %v119_v37 = vld [vmem:[#allocation4 + $0x298] sm:$0xff] }
  0x21   :  { %v601_v45 = vmax.f32 %v599_v40, %v600_v42  ;;  %v634_v46 = vmax.f32 %v111_v30, %v112_v31  ;;  %v566_v47 = vmax.f32 %v564_v43, %v565_v44  ;;  %v635_v48 = vsel %vm134_vm0, %v113_v32, -inf  ;;  %v96_v38 = vld [vmem:[#allocation4 + $0x1e0] sm:$0xff]  ;;  %v98_v40 = vld [vmem:[#allocation4 + $0x1f0] sm:$0xff] }
  0x22   :  { %v629_v49 = vmax.f32 %v108_v17, %v109_v18  ;;  %v264_v6 = vadd.f32 %v115_v63, %v114_v62  ;;  %v265_v8 = vsel %vm134_vm0, %v116_v1, 0.0  ;;  %v230_v10 = vsel %vm134_vm0, %v95_v4, 0.0 }
  0x23   :  { %187 = vadd.xlane.f32.xlu1 %v186_v52  ;;  %v630_v52 = vsel %vm134_vm0, %v110_v20, -inf  ;;  %v636_v57 = vmax.f32 %v634_v46, %v635_v48  ;;  %v530_v16 = vsel %vm134_vm0, %v50_v56, -inf  ;;  %v639_v18 = vmax.f32 %v114_v62, %v115_v63  ;;  %v54_v62 = vld [vmem:[#allocation4 + $0x90] sm:$0xff]  ;;  %v55_v63 = vld [vmem:[#allocation4 + $0x98] sm:$0xff] }
  0x24   :  { %147 = vadd.xlane.f32.xlu0 %v146_v54  ;;  %v48_v54 = vld [vmem:[#allocation4 + $0x60] sm:$0xff]  ;;  %v631_v59 = vmax.f32 %v629_v49, %v630_v52  ;;  %v266_v11 = vadd.f32 %v265_v8, %v264_v6  ;;  %v640_v20 = vsel %vm134_vm0, %v116_v1, -inf  ;;  %v199_v30 = vadd.f32 %v76_v23, %v75_v22 }
  0x25   :  { %v154_v61 = vadd.f32 %v49_v55, %v48_v54  ;;  %v529_v15 = vmax.f32 %v48_v54, %v49_v55  ;;  %v641_v29 = vmax.f32 %v639_v18, %v640_v20  ;;  %v200_v32 = vsel %vm134_vm0, %v77_v25, 0.0  ;;  %v120_v6 = vld [vmem:[#allocation4 + $0x2a0] sm:$0xff] }
  0x26   :  { %v160_v36 = vsel %vm134_vm0, %v53_v28, 0.0  ;;  %v270_v44 = vsel %vm134_vm0, %v119_v37, 0.0  ;;  %v235_v46 = vsel %vm134_vm0, %v98_v40, 0.0  ;;  %v574_v48 = vmax.f32 %v75_v22, %v76_v23 }
  0x27   :  { %222 = vadd.xlane.f32.xlu1 %v221_v58  ;;  %v194_v58 = vadd.f32 %v73_v51, %v72_v50  ;;  %v531_v19 = vmax.f32 %v529_v15, %v530_v16  ;;  %v535_v52 = vsel %vm134_vm0, %v53_v28, -inf  ;;  %v539_v23 = vmax.f32 %v54_v62, %v55_v63 }
  0x28   :  { %217 = vadd.xlane.f32.xlu0 %v216_v60  ;;  %v195_v60 = vsel %vm134_vm0, %v74_v53, 0.0  ;;  %vm344_vm4 = vcmask 195712   ;;  %vm351_vm5 = vcmask 261312   ;;  %vm358_vm6 = vcmask 326912  }
  0x29   :  { %v196_v5 = vadd.f32 %v195_v60, %v194_v58  ;;  %v78_v58 = vld [vmem:[#allocation4 + $0x150] sm:$0xff]  ;;  %v610_v60 = vsel %vm134_vm0, %v98_v40, -inf  ;;  %vm365_vm7 = vcmask 392512   ;;  %vm372_vm8 = vcmask 458112  }
  0x2a   :  { %vm379_vm9 = vcmask 523712   ;;  %vm498_vm10 = vcmask 1041409   ;;  %vm500_vm11 = vcmask 1042434   ;;  %vm502_vm12 = vcmask 1043459  }
  0x2b   :  { %562 = vmax.xlane.f32.xlu1 %v561_v0  ;;  %v155_v0 = vsel %vm134_vm0, %v50_v56, 0.0  ;;  %v645_v56 = vsel %vm134_vm0, %v119_v37, -inf  ;;  %vm872_vm13 = vcmask 1043456   ;;  %vm883_vm14 = vcmask 523264  }
  0x2c   :  { %522 = vmax.xlane.f32.xlu0 %v521_v2  ;;  %v93_v2 = vld [vmem:[#allocation4 + $0x1c8] sm:$0xff]  ;;  %v156_v7 = vadd.f32 %v155_v0, %v154_v61  ;;  %v80_v61 = vld [vmem:[#allocation4 + $0x160] sm:$0xff]  ;;  %vm958_vm15 = vcmask 31744  }
  0x2d   :  { %v229_v9 = vadd.f32 %v94_v3, %v93_v2  ;;  %v604_v21 = vmax.f32 %v93_v2, %v94_v3  ;;  %v56_v0 = vld [vmem:[#allocation4 + $0xa0] sm:$0xff]  ;;  %v580_v22 = vsel %vm134_vm0, %v80_v61, -inf }
  0x2e   :  { %v165_v8 = vsel %vm134_vm0, %v56_v0, 0.0 }
  0x2f   :  { %597 = vmax.xlane.f32.xlu1 %v596_v12  ;;  %v569_v12 = vmax.f32 %v72_v50, %v73_v51  ;;  %v231_v13 = vadd.f32 %v230_v10, %v229_v9  ;;  %v575_v50 = vsel %vm134_vm0, %v77_v25, -inf  ;;  %v122_v9 = vld [vmem:[#allocation4 + $0x2b0] sm:$0xff]  ;;  %v99_v10 = vld [vmem:[#allocation4 + $0x1f8] sm:$0xff] }
  0x30   :  { %592 = vmax.xlane.f32.xlu0 %v591_v14  ;;  %v570_v14 = vsel %vm134_vm0, %v74_v53, -inf  ;;  %v576_v53 = vmax.f32 %v574_v48, %v575_v50  ;;  %v275_v16 = vsel %vm134_vm0, %v122_v9, 0.0  ;;  %v650_v28 = vsel %vm134_vm0, %v122_v9, -inf  ;;  %v104_v48 = vld [vmem:[#allocation4 + $0x220] sm:$0xff] }
  0x31   :  { %v571_v17 = vmax.f32 %v569_v12, %v570_v14  ;;  %v101_v12 = vld [vmem:[#allocation4 + $0x208] sm:$0xff] }
  0x32   :  { %v240_v18 = vsel %vm134_vm0, %v101_v12, 0.0 }
  0x33   :  { %192 = vadd.xlane.f32.xlu1 %v191_v24  ;;  %v605_v24 = vsel %vm134_vm0, %v95_v4, -inf  ;;  %v205_v4 = vsel %vm134_vm0, %v80_v61, 0.0 }
  0x34   :  { %152 = vadd.xlane.f32.xlu0 %v151_v26  ;;  %v51_v26 = vld [vmem:[#allocation4 + $0x78] sm:$0xff]  ;;  %v606_v31 = vmax.f32 %v604_v21, %v605_v24  ;;  %v540_v24 = vsel %vm134_vm0, %v56_v0, -inf }
  0x35   :  { %v534_v51 = vmax.f32 %v51_v26, %v52_v27 }
  0x37   :  { %257 = vadd.xlane.f32.xlu1 %v256_v33  ;;  %v159_v33 = vadd.f32 %v52_v27, %v51_v26  ;;  %v536_v55 = vmax.f32 %v534_v51, %v535_v52  ;;  %v541_v27 = vmax.f32 %v539_v23, %v540_v24  ;;  %v131_v23 = vld [vmem:[#allocation4 + $0x2f8] sm:$0xff] }
  0x38   :  { %227 = vadd.xlane.f32.xlu0 %v226_v35  ;;  %v118_v35 = vld [vmem:[#allocation4 + $0x290] sm:$0xff] }
  0x39   :  { %v269_v42 = vadd.f32 %v118_v35, %v117_v34  ;;  %v161_v43 = vadd.f32 %v160_v36, %v159_v33  ;;  %v644_v54 = vmax.f32 %v117_v34, %v118_v35  ;;  %v83_v33 = vld [vmem:[#allocation4 + $0x178] sm:$0xff]  ;;  %v57_v34 = vld [vmem:[#allocation4 + $0xa8] sm:$0xff]  ;;  %v58_v35 = vld [vmem:[#allocation4 + $0xb0] sm:$0xff] }
  0x3a   :  { %v59_v36 = vld [vmem:[#allocation4 + $0xb8] sm:$0xff]  ;;  %v210_v40 = vsel %vm134_vm0, %v83_v33, 0.0 }
  0x3b   :  { %527 = vmax.xlane.f32.xlu1 %v526_v39  ;;  %v97_v39 = vld [vmem:[#allocation4 + $0x1e8] sm:$0xff]  ;;  %v646_v1 = vmax.f32 %v644_v54, %v645_v56  ;;  %v245_v54 = vsel %vm134_vm0, %v104_v48, 0.0 }
  0x3c   :  { %262 = vadd.xlane.f32.xlu0 %v261_v41  ;;  %v201_v41 = vadd.f32 %v200_v32, %v199_v30  ;;  %v81_v30 = vld [vmem:[#allocation4 + $0x168] sm:$0xff]  ;;  %v615_v32 = vsel %vm134_vm0, %v101_v12, -inf }
  0x3f   :  { %602 = vmax.xlane.f32.xlu1 %v601_v45  ;;  %v234_v45 = vadd.f32 %v97_v39, %v96_v38 }
  0x40   :  { %567 = vmax.xlane.f32.xlu0 %v566_v47  ;;  %v271_v47 = vadd.f32 %v270_v44, %v269_v42  ;;  %v123_v42 = vld [vmem:[#allocation4 + $0x2b8] sm:$0xff]  ;;  %v170_v44 = vsel %vm134_vm0, %v59_v36, 0.0 }
  0x41   :  { %v236_v49 = vadd.f32 %v235_v46, %v234_v45  ;;  %v125_v45 = vld [vmem:[#allocation4 + $0x2c8] sm:$0xff]  ;;  %v102_v46 = vld [vmem:[#allocation4 + $0x210] sm:$0xff] }
  0x42   :  { %v280_v52 = vsel %vm134_vm0, %v125_v45, 0.0  ;;  %v655_v0 = vsel %vm134_vm0, %v125_v45, -inf }
  0x43   :  { %637 = vmax.xlane.f32.xlu1 %v636_v57  ;;  %v609_v57 = vmax.f32 %v96_v38, %v97_v39 }
  0x44   :  { %632 = vmax.xlane.f32.xlu0 %v631_v59  ;;  %v79_v59 = vld [vmem:[#allocation4 + $0x158] sm:$0xff] }
  0x45   :  { %v204_v2 = vadd.f32 %v79_v59, %v78_v58  ;;  %v611_v3 = vmax.f32 %v609_v57, %v610_v60  ;;  %v579_v20 = vmax.f32 %v78_v58, %v79_v59  ;;  %v585_v58 = vsel %vm134_vm0, %v83_v33, -inf }
  0x46   :  { %v544_v59 = vmax.f32 %v57_v34, %v58_v35  ;;  %v545_v60 = vsel %vm134_vm0, %v59_v36, -inf  ;;  %v1158_v33 = vmov -inf  }
  0x47   :  { %197 = vadd.xlane.f32.xlu1 %v196_v5  ;;  %v164_v5 = vadd.f32 %v55_v63, %v54_v62  ;;  %v581_v25 = vmax.f32 %v579_v20, %v580_v22  ;;  %v129_v20 = vld [vmem:[#allocation4 + $0x2e8] sm:$0xff]  ;;  %35 = vst.msk [vmem:[#allocation3] sm:$0xf] %vm33_vm1, %v1158_v33 }
  0x48   :  { %157 = vadd.xlane.f32.xlu0 %v156_v7  ;;  %v121_v7 = vld [vmem:[#allocation4 + $0x2a8] sm:$0xff]  ;;  %v546_v63 = vmax.f32 %v544_v59, %v545_v60  ;;  %v875_v60 = vld [vmem:[%s1501_s1 + $0x8] sm:$0xff] }
  0x49   :  { %v274_v14 = vadd.f32 %v121_v7, %v120_v6  ;;  %v166_v15 = vadd.f32 %v165_v8, %v164_v5  ;;  %v649_v26 = vmax.f32 %v120_v6, %v121_v7  ;;  %v128_v5 = vld [vmem:[#allocation4 + $0x2e0] sm:$0xff]  ;;  %v105_v6 = vld [vmem:[#allocation4 + $0x228] sm:$0xff]  ;;  %v106_v7 = vld [vmem:[#allocation4 + $0x230] sm:$0xff] }
  0x4a   :  { %v107_v8 = vld [vmem:[#allocation4 + $0x238] sm:$0xff]  ;;  %v285_v12 = vsel %vm134_vm0, %v128_v5, 0.0 }
  0x4b   :  { %267 = vadd.xlane.f32.xlu1 %v266_v11  ;;  %v100_v11 = vld [vmem:[#allocation4 + $0x200] sm:$0xff]  ;;  %v651_v37 = vmax.f32 %v649_v26, %v650_v28  ;;  %v625_v22 = vsel %vm134_vm0, %v107_v8, -inf }
  0x4c   :  { %232 = vadd.xlane.f32.xlu0 %v231_v13  ;;  %v206_v13 = vadd.f32 %v205_v4, %v204_v2  ;;  %v126_v2 = vld [vmem:[#allocation4 + $0x2d0] sm:$0xff]  ;;  %v620_v4 = vsel %vm134_vm0, %v104_v48, -inf }
  0x4f   :  { %572 = vmax.xlane.f32.xlu1 %v571_v17  ;;  %v239_v17 = vadd.f32 %v100_v11, %v99_v10 }
  0x50   :  { %532 = vmax.xlane.f32.xlu0 %v531_v19  ;;  %v276_v19 = vadd.f32 %v275_v16, %v274_v14  ;;  %v250_v14 = vsel %vm134_vm0, %v107_v8, 0.0 }
  0x51   :  { %v241_v21 = vadd.f32 %v240_v18, %v239_v17  ;;  %v660_v18 = vsel %vm134_vm0, %v128_v5, -inf }
  0x53   :  { %642 = vmax.xlane.f32.xlu1 %v641_v29  ;;  %v614_v29 = vmax.f32 %v99_v10, %v100_v11 }
  0x54   :  { %607 = vmax.xlane.f32.xlu0 %v606_v31  ;;  %v82_v31 = vld [vmem:[#allocation4 + $0x170] sm:$0xff] }
  0x55   :  { %v209_v38 = vadd.f32 %v82_v31, %v81_v30  ;;  %v616_v39 = vmax.f32 %v614_v29, %v615_v32  ;;  %v584_v56 = vmax.f32 %v81_v30, %v82_v31  ;;  %v290_v29 = vsel %vm134_vm0, %v131_v23, 0.0 }
  0x56   :  { %v326_v32 = vlaneseq }
  0x57   :  { %202 = vadd.xlane.f32.xlu1 %v201_v41  ;;  %v169_v41 = vadd.f32 %v58_v35, %v57_v34  ;;  %v586_v61 = vmax.f32 %v584_v56, %v585_v58  ;;  %v1159_v34 = vmov 0.0  }
  0x58   :  { %162 = vadd.xlane.f32.xlu0 %v161_v43  ;;  %v124_v43 = vld [vmem:[#allocation4 + $0x2c0] sm:$0xff]  ;;  %34 = vst.msk [vmem:[#allocation2] sm:$0xf] %vm33_vm1, %v1159_v34  ;;  %1076 = vmatprep.subr.mxu0 %v1159_v34  ;;  %v1251_v35 = vand.u32 127, %v326_v32  ;;  %v1253_v36 = vshrl.u32 %v326_v32, 7 }
  0x59   :  { %v279_v50 = vadd.f32 %v124_v43, %v123_v42  ;;  %v171_v51 = vadd.f32 %v170_v44, %v169_v41  ;;  %v654_v62 = vmax.f32 %v123_v42, %v124_v43  ;;  %1095 = vmatprep.subr.mxu1 %v1159_v34  ;;  %v880_v43 = vld [vmem:[%s1501_s1 + $0x30] sm:$0xff]  ;;  %v879_v44 = vld [vmem:[%s1501_s1 + $0x28] sm:$0xff]  ;;  %1092 = vmatprep.mubr.msk.f32.mxu0 %vm1160_vm3, %v1159_v34 }
  0x5a   :  { %1097 = vmatprep.mubr.msk.f32.mxu1 %vm1160_vm3, %v1159_v34  ;;  %v339_v59 = vadd.s32 4294967280, %v1251_v35 }
  0x5b   :  { %272 = vadd.xlane.f32.xlu1 %v271_v47  ;;  %v103_v47 = vld [vmem:[#allocation4 + $0x218] sm:$0xff]  ;;  %v656_v9 = vmax.f32 %v654_v62, %v655_v0 }
  0x5c   :  { %237 = vadd.xlane.f32.xlu0 %v236_v49  ;;  %v211_v49 = vadd.f32 %v210_v40, %v209_v38  ;;  %v881_v38 = vld [vmem:[%s1501_s1 + $0x38] sm:$0xff]  ;;  %v1261_v40 = vsub.s32 %v1251_v35, %v1253_v36  ;;  %v874_v62 = vld [vmem:[%s1501_s1] sm:$0xff] }
  0x5d   :  { %1077 = vmatpush3.msra.mxu0 %v881_v38 }
  0x5e   :  { %1078 = vmatprep.subr.mxu0 %v1159_v34 }
  0x5f   :  { %577 = vmax.xlane.f32.xlu1 %v576_v53  ;;  %v244_v53 = vadd.f32 %v103_v47, %v102_v46  ;;  %1079 = vmatpush3.msra.mxu0 %v880_v43 }
  0x60   :  { %537 = vmax.xlane.f32.xlu0 %v536_v55  ;;  %v281_v55 = vadd.f32 %v280_v52, %v279_v50  ;;  %1080 = vmatprep.subr.mxu0 %v1159_v34  ;;  %v877_v50 = vld [vmem:[%s1501_s1 + $0x18] sm:$0xff] }
  0x61   :  { %v246_v57 = vadd.f32 %v245_v54, %v244_v53  ;;  %1081 = vmatpush3.msra.mxu0 %v879_v44  ;;  %v876_v54 = vld [vmem:[%s1501_s1 + $0x10] sm:$0xff] }
  0x62   :  { %1082 = vmatprep.subr.mxu0 %v1159_v34 }
  0x63   :  { %647 = vmax.xlane.f32.xlu1 %v646_v1  ;;  %v619_v1 = vmax.f32 %v102_v46, %v103_v47  ;;  %v878_v46 = vld [vmem:[%s1501_s1 + $0x20] sm:$0xff] }
  0x64   :  { %612 = vmax.xlane.f32.xlu0 %v611_v3  ;;  %v127_v3 = vld [vmem:[#allocation4 + $0x2d8] sm:$0xff]  ;;  %1083 = vmatpush3.msra.mxu0 %v878_v46 }
  0x65   :  { %v284_v10 = vadd.f32 %v127_v3, %v126_v2  ;;  %v621_v11 = vmax.f32 %v619_v1, %v620_v4  ;;  %v659_v16 = vmax.f32 %v126_v2, %v127_v3  ;;  %1084 = vmatprep.subr.mxu0 %v1159_v34  ;;  %v1299_v3 = vsub.s32 %v339_v59, %v1253_v36 }
  0x66   :  { %1085 = vmatpush3.msra.mxu0 %v877_v50 }
  0x67   :  { %207 = vadd.xlane.f32.xlu1 %v206_v13  ;;  %v249_v13 = vadd.f32 %v106_v7, %v105_v6  ;;  %v661_v24 = vmax.f32 %v659_v16, %v660_v18  ;;  %1086 = vmatprep.subr.mxu0 %v1159_v34 }
  0x68   :  { %167 = vadd.xlane.f32.xlu0 %v166_v15  ;;  %v286_v15 = vadd.f32 %v285_v12, %v284_v10  ;;  %1087 = vmatpush3.msra.mxu0 %v876_v54  ;;  %v353_v54 = vadd.s32 4294967264, %v1251_v35 }
  0x69   :  { %v251_v17 = vadd.f32 %v250_v14, %v249_v13  ;;  %1088 = vmatprep.subr.mxu0 %v1159_v34 }
  0x6a   :  { %1089 = vmatpush3.msra.mxu0 %v875_v60 }
  0x6b   :  { %277 = vadd.xlane.f32.xlu1 %v276_v19  ;;  %v624_v19 = vmax.f32 %v105_v6, %v106_v7  ;;  %1090 = vmatprep.subr.mxu0 %v1159_v34 }
  0x6c   :  { %242 = vadd.xlane.f32.xlu0 %v241_v21  ;;  %v130_v21 = vld [vmem:[#allocation4 + $0x2f0] sm:$0xff]  ;;  %1091 = vmatpush3.msra.mxu0 %v874_v62 }
  0x6d   :  { %v626_v26 = vmax.f32 %v624_v19, %v625_v22  ;;  %v289_v28 = vadd.f32 %v130_v21, %v129_v20 }
  0x6f   :  { %582 = vmax.xlane.f32.xlu1 %v581_v25  ;;  %v664_v25 = vmax.f32 %v129_v20, %v130_v21  ;;  %v291_v31 = vadd.f32 %v290_v29, %v289_v28  ;;  %v346_v20 = vadd.s32 4294967272, %v1251_v35 }
  0x70   :  { %542 = vmax.xlane.f32.xlu0 %v541_v27  ;;  %v665_v27 = vsel %vm134_vm0, %v131_v23, -inf }
  0x71   :  { %v666_v30 = vmax.f32 %v664_v25, %v665_v27  ;;  %v1317_v27 = vsub.s32 %v346_v20, %v1253_v36 }
  0x73   :  { %652 = vmax.xlane.f32.xlu1 %v651_v37  ;;  %v332_v37 = vadd.s32 4294967288, %v1251_v35 }
  0x74   :  { %617 = vmax.xlane.f32.xlu0 %v616_v39 }
  0x75   :  { %v1264_v42 = vsub.s32 %v332_v37, %v1253_v36 }
  0x77   :  { %212 = vadd.xlane.f32.xlu1 %v211_v49 }
  0x78   :  { %172 = vadd.xlane.f32.xlu0 %v171_v51 }
  0x7b   :  { %282 = vadd.xlane.f32.xlu1 %v281_v55 }
  0x7c   :  { %247 = vadd.xlane.f32.xlu0 %v246_v57 }
  0x7f   :  { %587 = vmax.xlane.f32.xlu1 %v586_v61 }
  0x80   :  { %547 = vmax.xlane.f32.xlu0 %v546_v63 }
  0x83   :  { %657 = vmax.xlane.f32.xlu1 %v656_v9 }
  0x84   :  { %622 = vmax.xlane.f32.xlu0 %v621_v11 }
  0x87   :  { %287 = vadd.xlane.f32.xlu1 %v286_v15 }
  0x88   :  { %252 = vadd.xlane.f32.xlu0 %v251_v17 }
  0x8b   :  { %662 = vmax.xlane.f32.xlu1 %v661_v24 }
  0x8c   :  { %627 = vmax.xlane.f32.xlu0 %v626_v26 }
  0x8f   :  { %667 = vmax.xlane.f32.xlu1 %v666_v30 }
  0x90   :  { %292 = vadd.xlane.f32.xlu0 %v291_v31 }
  0x9c   :  { %v178_v39 = vpop.xlane.xlu1 %177 }
  0x9d   :  { %v138_v41 = vpop.xlane.xlu0 %137  ;;  %v384_v47 = vrot.slane %v178_v39, %v1261_v40 }
  0x9e   :  { %v331_v51 = vrot.slane %v138_v41, %v1261_v40 }
  0xa0   :  { %v183_v45 = vpop.xlane.xlu1 %182 }
  0xa1   :  { %v388_v48 = vrot.slane %v183_v45, %v1264_v42  ;;  %v143_v49 = vpop.xlane.xlu0 %142 }
  0xa2   :  { %v336_v52 = vrot.slane %v143_v49, %v1264_v42 }
  0xa3   :  { %v389_v53 = vsel %vm337_vm2, %v388_v48, %v384_v47 }
  0xa4   :  { %v338_v55 = vsel %vm337_vm2, %v336_v52, %v331_v51  ;;  %v518_v56 = vpop.xlane.xlu1 %517 }
  0xa5   :  { %v708_v57 = vrot.slane %v518_v56, %v1264_v42  ;;  %v513_v58 = vpop.xlane.xlu0 %512 }
  0xa6   :  { %v704_v61 = vrot.slane %v513_v58, %v1261_v40 }
  0xa8   :  { %v709_v63 = vsel %vm337_vm2, %v708_v57, %v704_v61  ;;  %v558_v0 = vpop.xlane.xlu1 %557  ;;  %v1347_v61 = vsub.s32 %v353_v54, %v1253_v36 }
  0xa9   :  { %v747_v1 = vrot.slane %v558_v0, %v1264_v42  ;;  %v553_v2 = vpop.xlane.xlu0 %552 }
  0xaa   :  { %v743_v4 = vrot.slane %v553_v2, %v1261_v40 }
  0xac   :  { %v748_v5 = vsel %vm337_vm2, %v747_v1, %v743_v4  ;;  %v188_v6 = vpop.xlane.xlu1 %187 }
  0xad   :  { %v393_v7 = vrot.slane %v188_v6, %v1299_v3  ;;  %v148_v8 = vpop.xlane.xlu0 %147 }
  0xae   :  { %v343_v9 = vrot.slane %v148_v8, %v1299_v3 }
  0xaf   :  { %v394_v10 = vsel %vm344_vm4, %v393_v7, %v389_v53 }
  0xb0   :  { %v345_v11 = vsel %vm344_vm4, %v343_v9, %v338_v55  ;;  %v223_v12 = vpop.xlane.xlu1 %222 }
  0xb1   :  { %v427_v13 = vrot.slane %v223_v12, %v1264_v42  ;;  %v218_v14 = vpop.xlane.xlu0 %217 }
  0xb2   :  { %v423_v15 = vrot.slane %v218_v14, %v1261_v40 }
  0xb4   :  { %v428_v16 = vsel %vm337_vm2, %v427_v13, %v423_v15  ;;  %v563_v17 = vpop.xlane.xlu1 %562 }
  0xb5   :  { %v752_v18 = vrot.slane %v563_v17, %v1299_v3  ;;  %v523_v19 = vpop.xlane.xlu0 %522 }
  0xb6   :  { %v713_v21 = vrot.slane %v523_v19, %v1299_v3 }
  0xb7   :  { %v753_v22 = vsel %vm344_vm4, %v752_v18, %v748_v5 }
  0xb8   :  { %v714_v23 = vsel %vm344_vm4, %v713_v21, %v709_v63  ;;  %v598_v24 = vpop.xlane.xlu1 %597 }
  0xb9   :  { %v786_v25 = vrot.slane %v598_v24, %v1264_v42  ;;  %v593_v26 = vpop.xlane.xlu0 %592  ;;  %v360_v24 = vadd.s32 4294967256, %v1251_v35 }
  0xba   :  { %v782_v28 = vrot.slane %v593_v26, %v1261_v40  ;;  %v367_v26 = vadd.s32 4294967248, %v1251_v35 }
  0xbc   :  { %v787_v29 = vsel %vm337_vm2, %v786_v25, %v782_v28  ;;  %v193_v30 = vpop.xlane.xlu1 %192 }
  0xbd   :  { %v398_v31 = vrot.slane %v193_v30, %v1317_v27  ;;  %v153_v32 = vpop.xlane.xlu0 %152 }
  0xbe   :  { %v350_v33 = vrot.slane %v153_v32, %v1317_v27  ;;  %v1386_v32 = vsub.s32 %v367_v26, %v1253_v36 }
  0xbf   :  { %v399_v34 = vsel %vm351_vm5, %v398_v31, %v394_v10  ;;  %v374_v31 = vadd.s32 4294967240, %v1251_v35 }
  0xc0   :  { %v352_v37 = vsel %vm351_vm5, %v350_v33, %v345_v11  ;;  %v258_v38 = vpop.xlane.xlu1 %257 }
  0xc1   :  { %v228_v39 = vpop.xlane.xlu0 %227  ;;  %v462_v47 = vrot.slane %v258_v38, %v1261_v40  ;;  %v1394_v38 = vsub.s32 %v374_v31, %v1253_v36 }
  0xc2   :  { %v432_v41 = vrot.slane %v228_v39, %v1299_v3 }
  0xc4   :  { %v1327_v43 = vsel %vm344_vm4, %v432_v41, %v428_v16  ;;  %v528_v44 = vpop.xlane.xlu1 %527 }
  0xc5   :  { %v718_v45 = vrot.slane %v528_v44, %v1317_v27  ;;  %v263_v46 = vpop.xlane.xlu0 %262 }
  0xc6   :  { %v466_v48 = vrot.slane %v263_v46, %v1264_v42 }
  0xc7   :  { %v1333_v49 = vsel %vm351_vm5, %v718_v45, %v714_v23 }
  0xc8   :  { %v467_v50 = vsel %vm337_vm2, %v466_v48, %v462_v47  ;;  %v603_v51 = vpop.xlane.xlu1 %602 }
  0xc9   :  { %v791_v52 = vrot.slane %v603_v51, %v1299_v3  ;;  %v568_v53 = vpop.xlane.xlu0 %567 }
  0xca   :  { %v757_v55 = vrot.slane %v568_v53, %v1317_v27 }
  0xcb   :  { %v1340_v56 = vsel %vm344_vm4, %v791_v52, %v787_v29  ;;  %v1382_v29 = vsub.s32 %v360_v24, %v1253_v36 }
  0xcc   :  { %v1343_v57 = vsel %vm351_vm5, %v757_v55, %v753_v22  ;;  %v638_v58 = vpop.xlane.xlu1 %637 }
  0xcd   :  { %v825_v59 = vrot.slane %v638_v58, %v1264_v42  ;;  %v633_v60 = vpop.xlane.xlu0 %632 }
  0xce   :  { %v821_v62 = vrot.slane %v633_v60, %v1261_v40 }
  0xd0   :  { %v1351_v63 = vsel %vm337_vm2, %v825_v59, %v821_v62  ;;  %v198_v0 = vpop.xlane.xlu1 %197 }
  0xd1   :  { %v403_v1 = vrot.slane %v198_v0, %v1347_v61  ;;  %v158_v2 = vpop.xlane.xlu0 %157 }
  0xd2   :  { %v357_v4 = vrot.slane %v158_v2, %v1347_v61 }
  0xd3   :  { %v404_v5 = vsel %vm358_vm6, %v403_v1, %v399_v34 }
  0xd4   :  { %v359_v42 = vsel %vm358_vm6, %v357_v4, %v352_v37  ;;  %v268_v6 = vpop.xlane.xlu1 %267 }
  0xd5   :  { %v471_v7 = vrot.slane %v268_v6, %v1299_v3  ;;  %v1358_v8 = vpop.xlane.xlu0 %232 }
  0xd7   :  { %v1361_v40 = vsel %vm344_vm4, %v471_v7, %v467_v50 }
  0xd8   :  { %v573_v9 = vpop.xlane.xlu1 %572 }
  0xd9   :  { %v533_v10 = vpop.xlane.xlu0 %532  ;;  %v762_v53 = vrot.slane %v573_v9, %v1347_v61 }
  0xda   :  { %v723_v58 = vrot.slane %v533_v10, %v1347_v61 }
  0xdb   :  { %v763_v4 = vsel %vm358_vm6, %v762_v53, %v1343_v57  ;;  %v437_v57 = vrot.slane %v1358_v8, %v1317_v27 }
  0xdc   :  { %v1363_v11 = vpop.xlane.xlu1 %642 }
  0xdd   :  { %v1365_v12 = vpop.xlane.xlu0 %607  ;;  %v438_v8 = vsel %vm351_vm5, %v437_v57, %v1327_v43 }
  0xe0   :  { %v203_v13 = vpop.xlane.xlu1 %202 }
  0xe1   :  { %v163_v14 = vpop.xlane.xlu0 %162  ;;  %v408_v34 = vrot.slane %v203_v13, %v1382_v29 }
  0xe2   :  { %v364_v39 = vrot.slane %v163_v14, %v1382_v29 }
  0xe3   :  { %v409_v45 = vsel %vm365_vm7, %v408_v34, %v404_v5  ;;  %v796_v34 = vrot.slane %v1365_v12, %v1317_v27 }
  0xe4   :  { %v1367_v15 = vpop.xlane.xlu1 %272  ;;  %v366_v48 = vsel %vm365_vm7, %v364_v39, %v359_v42  ;;  %v724_v42 = vsel %vm358_vm6, %v723_v58, %v1333_v49 }
  0xe5   :  { %v1369_v16 = vpop.xlane.xlu0 %237 }
  0xe8   :  { %v578_v17 = vpop.xlane.xlu1 %577 }
  0xe9   :  { %v538_v18 = vpop.xlane.xlu0 %537  ;;  %v767_v59 = vrot.slane %v578_v17, %v1382_v29 }
  0xea   :  { %v728_v0 = vrot.slane %v538_v18, %v1382_v29 }
  0xeb   :  { %v768_v6 = vsel %vm365_vm7, %v767_v59, %v763_v4 }
  0xec   :  { %v1371_v19 = vpop.xlane.xlu1 %647  ;;  %v729_v10 = vsel %vm365_vm7, %v728_v0, %v724_v42  ;;  %v132_v42 = vld [vmem:[#allocation2] sm:$0xf] }
  0xed   :  { %v1373_v20 = vpop.xlane.xlu0 %612  ;;  %v835_v12 = vrot.slane %v1371_v19, %v1317_v27 }
  0xf0   :  { %v208_v21 = vpop.xlane.xlu1 %207 }
  0xf1   :  { %v168_v22 = vpop.xlane.xlu0 %167  ;;  %v413_v41 = vrot.slane %v208_v21, %v1386_v32 }
  0xf2   :  { %v371_v35 = vrot.slane %v168_v22, %v1386_v32  ;;  %v442_v22 = vrot.slane %v1369_v16, %v1347_v61 }
  0xf3   :  { %v414_v36 = vsel %vm372_vm8, %v413_v41, %v409_v45  ;;  %v801_v41 = vrot.slane %v1373_v20, %v1347_v61  ;;  %v797_v20 = vsel %vm351_vm5, %v796_v34, %v1340_v56 }
  0xf4   :  { %v1375_v23 = vpop.xlane.xlu1 %277  ;;  %v373_v51 = vsel %vm372_vm8, %v371_v35, %v366_v48  ;;  %v443_v16 = vsel %vm358_vm6, %v442_v22, %v438_v8 }
  0xf5   :  { %v1378_v25 = vpop.xlane.xlu0 %242  ;;  %v481_v19 = vrot.slane %v1375_v23, %v1347_v61 }
  0xf8   :  { %v583_v28 = vpop.xlane.xlu1 %582 }
  0xf9   :  { %v543_v30 = vpop.xlane.xlu0 %542  ;;  %v772_v1 = vrot.slane %v583_v28, %v1386_v32  ;;  %v447_v28 = vrot.slane %v1378_v25, %v1382_v29 }
  0xfa   :  { %v733_v2 = vrot.slane %v543_v30, %v1386_v32  ;;  %v830_v30 = vrot.slane %v1363_v11, %v1299_v3 }
  0xfb   :  { %v773_v13 = vsel %vm372_vm8, %v772_v1, %v768_v6  ;;  %v448_v25 = vsel %vm365_vm7, %v447_v28, %v443_v16 }
  0xfc   :  { %v1388_v33 = vpop.xlane.xlu1 %652  ;;  %v734_v17 = vsel %vm372_vm8, %v733_v2, %v729_v10  ;;  %v831_v43 = vsel %vm344_vm4, %v830_v30, %v1351_v63  ;;  %v802_v63 = vsel %vm358_vm6, %v801_v41, %v797_v20 }
  0xfd   :  { %v1391_v37 = vpop.xlane.xlu0 %617 }
  0xfe   :  { %v806_v3 = vrot.slane %v1391_v37, %v1382_v29  ;;  %v840_v37 = vrot.slane %v1388_v33, %v1347_v61 }
 0x100   :  { %v213_v44 = vpop.xlane.xlu1 %212  ;;  %v807_v56 = vsel %vm365_vm7, %v806_v3, %v802_v63 }
 0x101   :  { %v418_v46 = vrot.slane %v213_v44, %v1394_v38  ;;  %v173_v47 = vpop.xlane.xlu0 %172 }
 0x102   :  { %v378_v50 = vrot.slane %v173_v47, %v1394_v38 }
 0x103   :  { %v419_v52 = vsel %vm379_vm9, %v418_v46, %v414_v36  ;;  %v476_v46 = vrot.slane %v1367_v15, %v1317_v27 }
 0x104   :  { %v380_v54 = vsel %vm379_vm9, %v378_v50, %v373_v51  ;;  %v1408_v55 = vpop.xlane.xlu1 %282 }
 0x105   :  { %v499_v60 = vsel %vm498_vm10, %v419_v52, %v380_v54  ;;  %v248_v62 = vpop.xlane.xlu0 %247  ;;  %v486_v27 = vrot.slane %v1408_v55, %v1382_v29  ;;  %v836_v52 = vsel %vm351_vm5, %v835_v12, %v831_v43  ;;  %v477_v23 = vsel %vm351_vm5, %v476_v46, %v1361_v40  ;;  %v508_v40 = vld [vmem:[#allocation3] sm:$0xf] }
 0x106   :  { %v452_v31 = vrot.slane %v248_v62, %v1386_v32  ;;  %v841_v54 = vsel %vm358_vm6, %v840_v37, %v836_v52 }
 0x108   :  { %v588_v5 = vpop.xlane.xlu1 %587  ;;  %v453_v44 = vsel %vm372_vm8, %v452_v31, %v448_v25 }
 0x109   :  { %v777_v7 = vrot.slane %v588_v5, %v1394_v38  ;;  %v548_v9 = vpop.xlane.xlu0 %547 }
 0x10a   :  { %v738_v14 = vrot.slane %v548_v9, %v1394_v38 }
 0x10b   :  { %v778_v18 = vsel %vm379_vm9, %v777_v7, %v773_v13 }
 0x10c   :  { %v739_v49 = vsel %vm379_vm9, %v738_v14, %v734_v17  ;;  %v658_v21 = vpop.xlane.xlu1 %657 }
 0x10d   :  { %v857_v24 = vsel %vm498_vm10, %v778_v18, %v739_v49  ;;  %v623_v26 = vpop.xlane.xlu0 %622  ;;  %v845_v36 = vrot.slane %v658_v21, %v1382_v29  ;;  %v482_v29 = vsel %vm358_vm6, %v481_v19, %v477_v23  ;;  %v882_v49 = vld [vmem:[%s1502_s2] sm:$0xf]  ;;  %s1131_s2 = scalar_lea.vmem %s1053_s9, 64 }
 0x10e   :  { %v811_v45 = vrot.slane %v623_v26, %v1386_v32  ;;  %1096 = vmatpush3.msk.msra.mxu1 %vm872_vm13, %v882_v49  ;;  %p1132_p5 = scmp.ne.s32.totalorder %s1053_s9, %s1131_s2  ;;  %p1137_p7 = scmp.lt.s32.totalorder %s1131_s2, %s1131_s2 }
 0x10f   :  { %v846_v55 = vsel %vm365_vm7, %v845_v36, %v841_v54 }
 0x110   :  { %v288_v39 = vpop.xlane.xlu1 %287  ;;  %v812_v53 = vsel %vm372_vm8, %v811_v45, %v807_v56  ;;  %p1138_p8 = por %p1137_p7, %p1136_p6 }
 0x111   :  { %v253_v35 = vpop.xlane.xlu0 %252  ;;  %v491_v61 = vrot.slane %v288_v39, %v1386_v32 }
 0x112   :  { %v457_v11 = vrot.slane %v253_v35, %v1394_v38  ;;  %p1139_p9 = pnand %p1138_p8, %p1132_p5 }
 0x114   :  { %v458_v47 = vsel %vm379_vm9, %v457_v11, %v453_v44  ;;  %v663_v48 = vpop.xlane.xlu1 %662 }
 0x115   :  { %v501_v50 = vsel %vm500_vm11, %v458_v47, %v499_v60  ;;  %v628_v51 = vpop.xlane.xlu0 %627  ;;  %v850_v15 = vrot.slane %v663_v48, %v1386_v32  ;;  %v487_v32 = vsel %vm365_vm7, %v486_v27, %v482_v29 }
 0x116   :  { %v816_v33 = vrot.slane %v628_v51, %v1394_v38  ;;  %v492_v4 = vsel %vm372_vm8, %v491_v61, %v487_v32 }
 0x117   :  { %v851_v1 = vsel %vm372_vm8, %v850_v15, %v846_v55 }
 0x118   :  { %v817_v58 = vsel %vm379_vm9, %v816_v33, %v812_v53  ;;  %v668_v59 = vpop.xlane.xlu1 %667 }
 0x119   :  { %v858_v60 = vsel %vm500_vm11, %v817_v58, %v857_v24  ;;  %v855_v62 = vrot.slane %v668_v59, %v1394_v38  ;;  %v293_v0 = vpop.xlane.xlu0 %292 }
 0x11a   :  { %v496_v2 = vrot.slane %v293_v0, %v1394_v38 }
 0x11b   :  { %v856_v5 = vsel %vm379_vm9, %v855_v62, %v851_v1 }
 0x11c   :  { %v859_v6 = vsel %vm502_vm12, %v856_v5, %v858_v60  ;;  %v497_v7 = vsel %vm379_vm9, %v496_v2, %v492_v4 }
 0x11d   :  { %v861_v9 = vmax.f32 %v508_v40, %v859_v6  ;;  %v503_v10 = vsel %vm502_vm12, %v497_v7, %v501_v50 }
 0x11e   :  { %v505_v13 = vadd.f32 %v503_v10, %v132_v42 }
 0x11f   :  { %862 = vst.msk [vmem:[#allocation3] sm:$0xf] %vm33_vm1, %v861_v9 }
 0x120   :  { %507 = vst.msk [vmem:[#allocation2] sm:$0xf] %vm33_vm1, %v505_v13 }
 0x126   :  { %v868_v14 = vld [vmem:[#allocation3] sm:$0xf] }
 0x127   :  { %v866_v17 = vld [vmem:[#allocation2] sm:$0xf]  ;;  %v870_v38 = vrot.slane %v868_v14, 4 }
 0x128   :  { %v867_v18 = vmul.f32 0.0033333334, %v866_v17 }
 0x12a   :  { %v873_v57 = vsel %vm872_vm13, %v867_v18, %v870_v38 }
 0x12b   :  { %1093 = vmatmul.mubr.msk.f32.vlgmr.msra.gmra.mxu0 %vm883_vm14, %v873_v57 }
 0x1eb   :  { %v953_v21 = vpop.f32.mrf.mxu0 }
 0x1ec   :  { %v957_v22 = vmax.f32 %v953_v21, 0.0 }
 0x1ed   :  { %v1094_v24 = vpop.f32.mrf.mxu0 }
 0x1ee   :  { %1098 = vmatmul.mubr.msk.f32.vlgmr.msra.gmra.mxu1 %vm958_vm15, %v957_v22 }
 0x2ae   :  { %v1031_v26 = vpop.f32.mrf.mxu1 }
 0x2af   :  { %v1036_v28 = vrot.slane %v1031_v26, 4 }
 0x2b0   :  { %v1099_v30 = vpop.f32.mrf.mxu1 }
 0x2b1   :  { %v1038_v31 = vadd.f32 %v1036_v28, %v1031_v26 }
 0x2b3   :  { %v1064_v8 = vmul.f32 -1.442695, %v1038_v31 }
 0x2b5   :  { %1107 = vpow2.f32 %v1064_v8 }
 0x2c2   :  { %v1108_v34 = vpop.eup %1107 }
 0x2c3   :  { %v1042_v39 = vadd.f32 1.0, %v1108_v34 }
 0x2c5   :  { %1109 = vrcp.f32 %v1042_v39 }
 0x2d2   :  { %v1110_v16 = vpop.eup %1109 }
 0x2d3   :  { %1045 = vst.msk [vmem:[#allocation7] sm:$0xf] %vm33_vm1, %v1110_v16 }
 0x2d4   :  { %1142 = shalt.err (!%p1139_p9)
}
 0x2d5   :  { %1055 = dma.vmem_to_hbm [thread:$0]  %s1053_s9, 64, %s1503_s3, [#allocation6]  }
 0x2d6   :  { %1153 = dma.done.wait [#allocation6], 64  }
 0x2d7   :  { %1154 = vsyncadd [#allocation6], 4294967232 }
 0x2d8   :  { %1059 = vsyncpa [#allocation5], 1 }
 0x2d9   :  { %1060 = vsyncpa [#allocation6], 1 }

</bundles_post_ra>
